<compile_context>
chip_gen: v7x
topology: tpu7x:2x2x1
jax: 0.10.0
libtpu: 0.0.40
codegen_flags: <defaults>
</compile_context>

<pallas_src>
import functools

import jax
import jax.numpy as jnp
from jax.experimental import pallas as pl
from jax.experimental.pallas import tpu as pltpu


def _force_layer_kernel(x_ref, t_ref, w1_ref, b1_ref, w2_ref, b2_ref,
                        r_exp_h_ref, inv_r_ref, o_ref, *, dim):
    # --- force MLP: Linear(1, W) -> Tanh -> Linear(W, dim) ---
    # First layer has contraction K=1: do it on the VPU as a broadcast FMA
    # (rank-1 outer product); pushing it through the MXU is pure waste.
    t = t_ref[...]                                          # (tb, 1)
    hid = jnp.tanh(t * w1_ref[...] + b1_ref[...])           # (tb, W) VPU + EUP
    f = jnp.dot(hid, w2_ref[...],
                preferred_element_type=jnp.float32) + b2_ref[...]   # (tb, dim)

    # --- exact solution of dp/dt = -R p + f(t) over step h (R diagonal) ---
    # exp(-R h) and 1/R are grid-invariant and precomputed in the wrapper.
    p = x_ref[:, :dim]                                      # (tb, dim)
    q = x_ref[:, dim:]                                      # (tb, dim)

    b = f * inv_r_ref[...]                                  # (tb, dim)
    p_new = (p - b) * r_exp_h_ref[...] + b                  # (tb, dim)

    # Two direct stores into the halves of the output block (no lane-axis
    # concatenate, no extra VMEM temporary).
    o_ref[:, :dim] = p_new.astype(o_ref.dtype)
    o_ref[:, dim:] = q.astype(o_ref.dtype)


def force_layer_forward(x, t, h, params, *, max_batch_tile=1024):
    """Pallas implementation of the strupnet force Layer
    (learn_resistance=True, learn_force=True)."""
    B, two_dim = x.shape
    dim = two_dim // 2
    w1, b1, w2, b2, sqrt_r = (params["w1"], params["b1"],
                              params["w2"], params["b2"],
                              params["sqrt_r_diag"])
    W = w1.shape[1]

    # Grid-invariant parameter math hoisted out of the kernel.  This is O(dim)
    # work on parameters only (not on x/t), removes a per-tile EUP exp and a
    # divide, and folds the scalar h away entirely.
    r_diag = (sqrt_r.astype(jnp.float32) ** 2).reshape(1, dim)
    h_f32 = jnp.asarray(h, jnp.float32)
    r_exp_h = jnp.exp(-r_diag * h_f32)                      # (1, dim)
    inv_r = 1.0 / r_diag                                    # (1, dim), exact

    b1_2d = b1.reshape(1, W)
    b2_2d = b2.reshape(1, dim)

    # Batch tiling: full-array block for small B (layout-legal since the block
    # equals the array), otherwise a multiple-of-8 tile so the pipeline
    # double-buffers and both v7x TensorCores get work via the parallel axis.
    tb = B if B <= max_batch_tile else max_batch_tile
    grid = (pl.cdiv(B, tb),)

    kernel = functools.partial(_force_layer_kernel, dim=dim)

    return pl.pallas_call(
        kernel,
        out_shape=jax.ShapeDtypeStruct((B, two_dim), x.dtype),
        grid_spec=pltpu.PrefetchScalarGridSpec(
            num_scalar_prefetch=0,
            grid=grid,
            in_specs=[
                pl.BlockSpec((tb, two_dim), lambda i: (i, 0)),   # x
                pl.BlockSpec((tb, 1),       lambda i: (i, 0)),   # t
                pl.BlockSpec((1, W),        lambda i: (0, 0)),   # w1
                pl.BlockSpec((1, W),        lambda i: (0, 0)),   # b1
                pl.BlockSpec((W, dim),      lambda i: (0, 0)),   # w2
                pl.BlockSpec((1, dim),      lambda i: (0, 0)),   # b2
                pl.BlockSpec((1, dim),      lambda i: (0, 0)),   # exp(-R h)
                pl.BlockSpec((1, dim),      lambda i: (0, 0)),   # 1 / R
            ],
            out_specs=pl.BlockSpec((tb, two_dim), lambda i: (i, 0)),
        ),
        compiler_params=pltpu.CompilerParams(
            dimension_semantics=("parallel",),
            vmem_limit_bytes=32 * 1024 * 1024),
    )(x, t, w1, b1_2d, w2, b2_2d, r_exp_h, inv_r)


def force_layer_reference(x, t, h, params, dim):
    """Pure-JAX reference mirroring the PyTorch forward exactly."""
    p, q = x[..., :dim], x[..., dim:]
    r_diag = params["sqrt_r_diag"] ** 2
    r_exp_h = jnp.exp(-r_diag * h)
    hid = jnp.tanh(t @ params["w1"] + params["b1"])
    f = hid @ params["w2"] + params["b2"]
    b = f / r_diag
    p = (p - b) * r_exp_h + b
    return jnp.concatenate([p, q], axis=-1)


if __name__ == "__main__":
    dim, width, B = 4, 32, 8
    key = jax.random.PRNGKey(0)
    kx, kt, k1, k2, k3, k4, k5 = jax.random.split(key, 7)

    x = jax.random.normal(kx, (B, 2 * dim), jnp.float32)
    t = jax.random.normal(kt, (B, 1), jnp.float32)
    h = jnp.float32(0.1)

    # Deterministic synthetic parameters (shapes from Layer.__init__):
    #   force = Linear(1, width) -> Tanh -> Linear(width, dim)
    #   sqrt_r_diag: (dim,)
    params = {
        "w1": jax.random.normal(k1, (1, width), jnp.float32) * 0.5,
        "b1": jax.random.normal(k2, (width,), jnp.float32) * 0.1,
        "w2": jax.random.normal(k3, (width, dim), jnp.float32) * 0.2,
        "b2": jax.random.normal(k4, (dim,), jnp.float32) * 0.1,
        "sqrt_r_diag": jax.random.normal(k5, (dim,), jnp.float32) * 0.8 + 1.0,
    }

    out = force_layer_forward(x, t, h, params)
    jax.block_until_ready(out)

    ref = force_layer_reference(x, t, h, params, dim)
    assert out.shape == (B, 2 * dim)
    assert jnp.allclose(out, ref, atol=1e-5, rtol=1e-5), "mismatch vs reference"

    print("KERNEL_OK")
</pallas_src>

<mosaic_0001>
module attributes {stable_mosaic.version = 11 : i64} {
  func.func @_force_layer_kernel(%arg0: i32, %arg1: memref<8x8xf32, #tpu.memory_space<vmem>>, %arg2: memref<8x1xf32, #tpu.memory_space<vmem>>, %arg3: memref<1x32xf32, #tpu.memory_space<vmem>>, %arg4: memref<1x32xf32, #tpu.memory_space<vmem>>, %arg5: memref<32x4xf32, #tpu.memory_space<vmem>>, %arg6: memref<1x4xf32, #tpu.memory_space<vmem>>, %arg7: memref<1x4xf32, #tpu.memory_space<vmem>>, %arg8: memref<1x4xf32, #tpu.memory_space<vmem>>, %arg9: memref<8x8xf32, #tpu.memory_space<vmem>>) attributes {dimension_semantics = [#tpu.dimension_semantics<parallel>], iteration_bounds = array<i64: 1>, scalar_prefetch = 0 : i64, scratch_operands = 0 : i64, tpu.core_type = #tpu.core_type<tc>, window_params = [{transform_indices = @transform_0, window_bounds = array<i64: 8, 8>}, {transform_indices = @transform_1, window_bounds = array<i64: 8, 1>}, {pipeline_mode = #tpu.pipeline_mode<synchronous>, transform_indices = @transform_2, window_bounds = array<i64: 1, 32>}, {pipeline_mode = #tpu.pipeline_mode<synchronous>, transform_indices = @transform_3, window_bounds = array<i64: 1, 32>}, {pipeline_mode = #tpu.pipeline_mode<synchronous>, transform_indices = @transform_4, window_bounds = array<i64: 32, 4>}, {pipeline_mode = #tpu.pipeline_mode<synchronous>, transform_indices = @transform_5, window_bounds = array<i64: 1, 4>}, {pipeline_mode = #tpu.pipeline_mode<synchronous>, transform_indices = @transform_6, window_bounds = array<i64: 1, 4>}, {pipeline_mode = #tpu.pipeline_mode<synchronous>, transform_indices = @transform_7, window_bounds = array<i64: 1, 4>}, {transform_indices = @transform_8, window_bounds = array<i64: 8, 8>}]} {
    %c0 = arith.constant 0 : index
    %c0_0 = arith.constant 0 : index
    %0 = vector.load %arg2[%c0, %c0_0] : memref<8x1xf32, #tpu.memory_space<vmem>>, vector<8x1xf32>
    %c0_1 = arith.constant 0 : index
    %c0_2 = arith.constant 0 : index
    %1 = vector.load %arg3[%c0_1, %c0_2] : memref<1x32xf32, #tpu.memory_space<vmem>>, vector<1x32xf32>
    %2 = vector.broadcast %0 : vector<8x1xf32> to vector<8x32xf32>
    %3 = vector.broadcast %1 : vector<1x32xf32> to vector<8x32xf32>
    %4 = arith.mulf %2, %3 : vector<8x32xf32>
    %c0_3 = arith.constant 0 : index
    %c0_4 = arith.constant 0 : index
    %5 = vector.load %arg4[%c0_3, %c0_4] : memref<1x32xf32, #tpu.memory_space<vmem>>, vector<1x32xf32>
    %6 = vector.broadcast %5 : vector<1x32xf32> to vector<8x32xf32>
    %7 = arith.addf %4, %6 : vector<8x32xf32>
    %8 = math.tanh %7 : vector<8x32xf32>
    %c0_5 = arith.constant 0 : index
    %c0_6 = arith.constant 0 : index
    %9 = vector.load %arg5[%c0_5, %c0_6] : memref<32x4xf32, #tpu.memory_space<vmem>>, vector<32x4xf32>
    %cst = arith.constant dense<0.000000e+00> : vector<8x4xf32>
    %10 = tpu.matmul %8, %9, %cst {dimension_numbers = #tpu.dot_dimension_numbers<[1], [0], [0], [1], [0, 0, 1, 1], [], []>} : vector<8x32xf32>, vector<32x4xf32>, vector<8x4xf32> -> vector<8x4xf32>
    %c0_7 = arith.constant 0 : index
    %c0_8 = arith.constant 0 : index
    %11 = vector.load %arg6[%c0_7, %c0_8] : memref<1x4xf32, #tpu.memory_space<vmem>>, vector<1x4xf32>
    %12 = vector.broadcast %11 : vector<1x4xf32> to vector<8x4xf32>
    %13 = arith.addf %10, %12 : vector<8x4xf32>
    %c0_9 = arith.constant 0 : index
    %c0_10 = arith.constant 0 : index
    %14 = vector.load %arg1[%c0_9, %c0_10] : memref<8x8xf32, #tpu.memory_space<vmem>>, vector<8x4xf32>
    %c0_11 = arith.constant 0 : index
    %c4 = arith.constant 4 : index
    %15 = vector.load %arg1[%c0_11, %c4] : memref<8x8xf32, #tpu.memory_space<vmem>>, vector<8x4xf32>
    %c0_12 = arith.constant 0 : index
    %c0_13 = arith.constant 0 : index
    %16 = vector.load %arg8[%c0_12, %c0_13] : memref<1x4xf32, #tpu.memory_space<vmem>>, vector<1x4xf32>
    %17 = vector.broadcast %16 : vector<1x4xf32> to vector<8x4xf32>
    %18 = arith.mulf %13, %17 : vector<8x4xf32>
    %19 = arith.subf %14, %18 : vector<8x4xf32>
    %c0_14 = arith.constant 0 : index
    %c0_15 = arith.constant 0 : index
    %20 = vector.load %arg7[%c0_14, %c0_15] : memref<1x4xf32, #tpu.memory_space<vmem>>, vector<1x4xf32>
    %21 = vector.broadcast %20 : vector<1x4xf32> to vector<8x4xf32>
    %22 = arith.mulf %19, %21 : vector<8x4xf32>
    %23 = arith.addf %22, %18 : vector<8x4xf32>
    %c0_16 = arith.constant 0 : index
    %c0_17 = arith.constant 0 : index
    %24 = vector.load %arg9[%c0_16, %c0_17] : memref<8x8xf32, #tpu.memory_space<vmem>>, vector<8x4xf32>
    tpu.vector_store %arg9[%c0_16, %c0_17], %23 {strides = array<i32>} : memref<8x8xf32, #tpu.memory_space<vmem>>, vector<8x4xf32>,
    %c0_18 = arith.constant 0 : index
    %c4_19 = arith.constant 4 : index
    %25 = vector.load %arg9[%c0_18, %c4_19] : memref<8x8xf32, #tpu.memory_space<vmem>>, vector<8x4xf32>
    tpu.vector_store %arg9[%c0_18, %c4_19], %15 {strides = array<i32>} : memref<8x8xf32, #tpu.memory_space<vmem>>, vector<8x4xf32>,
    return
  }
  func.func @transform_0(%arg0: i32) -> (i32, i32) {
    %c0_i32 = arith.constant 0 : i32
    %c0_i32_0 = arith.constant 0 : i32
    return %arg0, %c0_i32 : i32, i32
  }
  func.func @transform_1(%arg0: i32) -> (i32, i32) {
    %c0_i32 = arith.constant 0 : i32
    %c0_i32_0 = arith.constant 0 : i32
    return %arg0, %c0_i32 : i32, i32
  }
  func.func @transform_2(%arg0: i32) -> (i32, i32) {
    %c0_i32 = arith.constant 0 : i32
    %c0_i32_0 = arith.constant 0 : i32
    %c0_i32_1 = arith.constant 0 : i32
    return %c0_i32, %c0_i32_0 : i32, i32
  }
  func.func @transform_3(%arg0: i32) -> (i32, i32) {
    %c0_i32 = arith.constant 0 : i32
    %c0_i32_0 = arith.constant 0 : i32
    %c0_i32_1 = arith.constant 0 : i32
    return %c0_i32, %c0_i32_0 : i32, i32
  }
  func.func @transform_4(%arg0: i32) -> (i32, i32) {
    %c0_i32 = arith.constant 0 : i32
    %c0_i32_0 = arith.constant 0 : i32
    %c0_i32_1 = arith.constant 0 : i32
    return %c0_i32, %c0_i32_0 : i32, i32
  }
  func.func @transform_5(%arg0: i32) -> (i32, i32) {
    %c0_i32 = arith.constant 0 : i32
    %c0_i32_0 = arith.constant 0 : i32
    %c0_i32_1 = arith.constant 0 : i32
    return %c0_i32, %c0_i32_0 : i32, i32
  }
  func.func @transform_6(%arg0: i32) -> (i32, i32) {
    %c0_i32 = arith.constant 0 : i32
    %c0_i32_0 = arith.constant 0 : i32
    %c0_i32_1 = arith.constant 0 : i32
    return %c0_i32, %c0_i32_0 : i32, i32
  }
  func.func @transform_7(%arg0: i32) -> (i32, i32) {
    %c0_i32 = arith.constant 0 : i32
    %c0_i32_0 = arith.constant 0 : i32
    %c0_i32_1 = arith.constant 0 : i32
    return %c0_i32, %c0_i32_0 : i32, i32
  }
  func.func @transform_8(%arg0: i32) -> (i32, i32) {
    %c0_i32 = arith.constant 0 : i32
    %c0_i32_0 = arith.constant 0 : i32
    return %arg0, %c0_i32 : i32, i32
  }
}

</mosaic_0001>

<bundles_post_ra>
// kernel: tpu_custom_call.1
= control target key start
LH: loop header
LB: loop body
LE: loop exit
PB: predicated region body
PF: predicated region fallthrough
CT: control target
= control target key end

     0   :  { %v235_v1 = vmov 0   ;;  %s330_s0 = inlined_call_operand.vmem [shape: f32[8,8], index: 0, kind: input, shape index: {}]   ;;  %s331_s1 = inlined_call_operand.vmem [shape: f32[8,1], index: 1, kind: input, shape index: {}]   ;;  %s332_s2 = inlined_call_operand.vmem [shape: f32[1,32], index: 2, kind: input, shape index: {}]   ;;  %s333_s3 = inlined_call_operand.vmem [shape: f32[1,32], index: 3, kind: input, shape index: {}]   ;;  %s334_s4 = inlined_call_operand.vmem [shape: f32[32,4], index: 4, kind: input, shape index: {}]   ;;  %s335_s5 = inlined_call_operand.vmem [shape: f32[1,4], index: 5, kind: input, shape index: {}]   ;;  %s336_s6 = inlined_call_operand.vmem [shape: f32[1,4], index: 6, kind: input, shape index: {}]   ;;  %s337_s7 = inlined_call_operand.vmem [shape: f32[1,4], index: 7, kind: input, shape index: {}]   ;;  %s338_s8 = inlined_call_operand.hbm [shape: f32[8,8], index: 8, kind: output, shape index: {}]  }
   0x1   :  { %v30_v0 = vld [vmem:[%s331_s1] sm:$0xff]  ;;  %208 = vset.pattern.permute.xlu0 %v235_v1 }
   0x2   :  { %13 = vsyncpa [#allocation3], 0  ;;  %34 = vperm.xlu0 %208, %v30_v0   ;;  %v53_v2 = vld [vmem:[%s334_s4] sm:$0xff]  ;;  %v54_v3 = vld [vmem:[%s334_s4 + $0x8] sm:$0xff]  ;;  %v236_v5 = vmov 0.0|0.0   ;;  %vm237_vm0 = vmmov 0  }
   0x3   :  { %v55_v4 = vld [vmem:[%s334_s4 + $0x10] sm:$0xff]  ;;  %197 = vmatprep.subr.bf16.mxu0 %v236_v5  ;;  %v198_v6 = vpack.c.bf16 %v54_v3, %v53_v2  ;;  %v56_v7 = vld [vmem:[%s334_s4 + $0x18] sm:$0xff]  ;;  %v238_v8 = vmov 0.0   ;;  %v175_v10 = vld [vmem:[%s332_s2] ss:$0 sm:$0xff]  ;;  %vm64_vm1 = vcmask 261120  }
   0x4   :  { %194 = vmatprep.mubr.msk.f32.mxu0 %vm237_vm0, %v238_v8  ;;  %v201_v9 = vpack.c.bf16 %v56_v7, %v55_v4  ;;  %v176_v11 = vld [vmem:[%s333_s3] ss:$0 sm:$0xff]  ;;  %s239_s23 = smov [#allocation2]   ;;  %vm157_vm2 = vcmask 31744   ;;  %vm159_vm3 = vcmask 64544  }
   0x5   :  { %199 = vmatpush3.bf16.msra.mxu0 %v198_v6  ;;  %v177_v16 = vld [vmem:[%s335_s5] ss:$0 sm:$0xff]  ;;  %s167_s5 = sshll.u32 %s239_s23, 4  ;;  %s168_s5 = int_to_ptr.vmem [resolvable:$true] %s167_s5 }
   0x6   :  { %200 = vmatprep.subr.bf16.mxu0 %v236_v5  ;;  %v179_v18 = vld [vmem:[%s337_s7] ss:$0 sm:$0xff]  ;;  %s211_s7 = scalar_lea.vmem %s168_s5, 128  ;;  %p216_p1 = scmp.lt.s32.totalorder %s168_s5, %s168_s5 }
   0x7   :  { %v138_v21 = vld [vmem:[%s330_s0] sm:$0xff]  ;;  %p212_p0 = scmp.ne.s32.totalorder %s168_s5, %s211_s7  ;;  %p217_p2 = scmp.lt.s32.totalorder %s211_s7, %s211_s7 }
   0x8   :  { %v180_v23 = vld [vmem:[%s336_s6] ss:$0 sm:$0xff] }
   0x9   :  { %202 = vmatpush3.bf16.msra.mxu0 %v201_v9  ;;  %p218_p3 = por %p217_p2, %p216_p1 }
   0xb   :  { %p219_p4 = pnand %p218_p3, %p212_p0 }
  0x81   :  { %v35_v12 = vpop.permute.xlu0 %34 }
  0x82   :  { %v43_v13 = vmul.f32 %v175_v10, %v35_v12 }
  0x84   :  { %v51_v14 = vadd.f32 %v176_v11, %v43_v13 }
  0x86   :  { %209 = vtanh.f32 %v51_v14 }
  0x90   :  { %v210_v15 = vpop.eup %209 }
  0x91   :  { %195 = vmatmul.mubr.msk.f32.vlgmr.msra.gmra.mrb[0].mxu0 %vm64_vm1, %v210_v15 }
 0x164   :  { %v134_v17 = vpop.f32.mrb[0].mxu0 }
 0x165   :  { %v135_v19 = vadd.f32 %v177_v16, %v134_v17  ;;  %v196_v20 = vpop.f32.mrb[1].mxu0 }
 0x167   :  { %v146_v22 = vmul.f32 %v179_v18, %v135_v19 }
 0x169   :  { %v147_v24 = vsub.f32 %v138_v21, %v146_v22 }
 0x16b   :  { %v155_v25 = vmul.f32 %v180_v23, %v147_v24 }
 0x16d   :  { %v156_v26 = vadd.f32 %v155_v25, %v146_v22 }
 0x16f   :  { %158 = vst.msk [vmem:[#allocation2] sm:$0xff] %vm157_vm2, %v156_v26 }
 0x170   :  { %160 = vst.msk [vmem:[#allocation2] sm:$0xff] %vm159_vm3, %v138_v21 }
 0x171   :  { %222 = shalt.err (!%p219_p4)
}
 0x172   :  { %s223_s6 = scalar_lea.hbm %s338_s8, 128 }
 0x173   :  { %p224_p5 = scmp.ne.s32.totalorder %s338_s8, %s223_s6  ;;  %p227_p6 = scmp.lt.u32.totalorder %s223_s6, %s338_s8 }
 0x175   :  { %p229_p7 = pnand %p227_p6, %p224_p5 }
 0x177   :  { %232 = shalt.err (!%p229_p7)
}
 0x178   :  { %170 = dma.vmem_to_hbm [thread:$0]  %s168_s5, 128, %s338_s8, [#allocation3]  }
 0x179   :  { %233 = dma.done.wait [#allocation3], 128  }
 0x17a   :  { %234 = vsyncadd [#allocation3], 4294967168 }
 0x17b   :  { %174 = vsyncpa [#allocation3], 1 }

</bundles_post_ra>
